<compile_context>
chip_gen: v5e
topology: v5e:2x2
jax: 0.10.0
libtpu: 0.0.40
codegen_flags: <defaults>
</compile_context>

<pallas_src>
import functools
import math

import jax
import jax.numpy as jnp
from jax.experimental import pallas as pl
from jax.experimental.pallas import tpu as pltpu

_INV_SQRT2 = 1.0 / math.sqrt(2.0)


def _round_up(a, b):
    return (a + b - 1) // b * b


def _gelu(h, approximate):
    if approximate:
        # tanh GELU: one EUP transcendental per element (separate VLIW slot).
        c = math.sqrt(2.0 / math.pi)
        return 0.5 * h * (1.0 + jnp.tanh(c * (h + 0.044715 * h * h * h)))
    # exact GELU (nn.GELU default): 0.5*h*(1 + erf(h/sqrt(2))), in f32.
    return 0.5 * h * (1.0 + jax.lax.erf(h * _INV_SQRT2))


def _partial_product(x_ref, wfc_ref, bfc_ref, wproj_ref, approximate):
    # c_fc slice for this hidden tile: (tm, th), f32 accumulation on the MXU.
    # NOTE: default MXU precision for f32 inputs is reduced-precision passes;
    # pass precision=jax.lax.Precision.HIGHEST here if exact fp32 parity with
    # a PyTorch fp32 Linear is required (at ~3-6x MXU cost).
    h = jnp.dot(x_ref[...], wfc_ref[...], preferred_element_type=jnp.float32)
    h = h + bfc_ref[...].astype(jnp.float32)
    h = _gelu(h, approximate)
    # c_proj partial product for this hidden tile: (tm, Wp) in f32.
    return jnp.dot(h.astype(wproj_ref.dtype), wproj_ref[...],
                   preferred_element_type=jnp.float32)


def _mlp_kernel_f32out(x_ref, wfc_ref, bfc_ref, wproj_ref, bproj_ref, o_ref,
                       *, approximate):
    # f32 output: its block index is invariant in j, so the output tile stays
    # VMEM-resident across the reduction - accumulate directly into it.
    j = pl.program_id(1)
    p = _partial_product(x_ref, wfc_ref, bfc_ref, wproj_ref, approximate)

    @pl.when(j == 0)
    def _():
        o_ref[...] = p + bproj_ref[...].astype(jnp.float32)

    @pl.when(j > 0)
    def _():
        o_ref[...] += p


def _mlp_kernel_scratch(x_ref, wfc_ref, bfc_ref, wproj_ref, bproj_ref, o_ref,
                        acc_ref, *, approximate):
    # non-f32 (e.g. bf16) output: accumulate in an f32 scratch, cast once.
    j = pl.program_id(1)
    p = _partial_product(x_ref, wfc_ref, bfc_ref, wproj_ref, approximate)

    @pl.when(j == 0)
    def _():
        acc_ref[...] = p

    @pl.when(j > 0)
    def _():
        acc_ref[...] += p

    @pl.when(j == pl.num_programs(1) - 1)
    def _():
        o_ref[...] = (acc_ref[...] + bproj_ref[...].astype(jnp.float32)
                      ).astype(o_ref.dtype)


def _tile_config(M, Wp, x_bytes, w_bytes, out_bytes, use_scratch):
    """Generation-aware (tm, th, vmem_limit_bytes) selection."""
    kind = ""
    try:
        kind = jax.devices()[0].device_kind.lower()
    except Exception:
        pass

    if ("v5 lite" in kind) or ("v5e" in kind) or ("v5lite" in kind):
        # v5e: ~240 flops/byte needed -> tm=256 is balanced; raise the 16 MiB
        # default scoped VMEM so th=512 double-buffered weights still fit.
        tm, th, vmem_limit, num_tc = 256, 512, 100 << 20, 1
    elif "v6" in kind:
        # v6e: needs ~640 flops/byte to be MXU-bound -> large row tile.
        tm, th, vmem_limit, num_tc = 1024, 512, 100 << 20, 1
    elif ("7x" in kind) or ("v7" in kind):
        # v7x: 64 MiB VMEM/TC, 3.2 TB/s HBM -> tm~384 is near roofline;
        # spend VMEM on keeping double-buffering intact.
        tm, th, vmem_limit, num_tc = 384, 512, 56 << 20, 2
    else:
        tm, th, vmem_limit, num_tc = 512, 512, 64 << 20, 1

    # Never tile rows past the (padded) row count.
    tm = min(tm, _round_up(M, 16))
    # Multi-TensorCore chips: keep >= 2 row tiles so the "parallel" axis can be
    # split across cores (skip for tiny M where it does not matter).
    if num_tc >= 2 and M >= 32:
        tm = min(tm, _round_up((M + num_tc - 1) // num_tc, 16))

    budget = int(vmem_limit * 0.85)

    def footprint(tm_, th_):
        fp = 2 * tm_ * Wp * x_bytes           # double-buffered x tile
        fp += 2 * tm_ * Wp * out_bytes        # double-buffered output tile
        fp += 2 * Wp * th_ * w_bytes          # double-buffered W_fc slice
        fp += 2 * th_ * Wp * w_bytes          # double-buffered W_proj slice
        fp += 2 * (th_ + Wp) * w_bytes        # biases (tiny)
        fp += tm_ * th_ * 4                   # h temporary (f32)
        if use_scratch:
            fp += tm_ * Wp * 4                # f32 accumulator scratch
        return fp

    # Prefer shrinking th (per-step granularity) before tm (arith. intensity).
    while footprint(tm, th) > budget and th > 256:
        th //= 2
    while footprint(tm, th) > budget and tm > 256:
        tm = max(256, tm // 2)

    return tm, th, vmem_limit


def mlp_pallas(x, w_fc, b_fc, w_proj, b_proj, *, approximate_gelu=False):
    """y = c_proj(gelu(c_fc(x))).

    x: (..., W). Weights stored pre-transposed so the kernel computes x @ W:
      w_fc (W, 4W), b_fc (1, 4W), w_proj (4W, W), b_proj (1, W).
    """
    orig_shape = x.shape
    W = orig_shape[-1]
    H = w_fc.shape[1]                      # 4 * W
    x2 = x.reshape(-1, W)
    M = x2.shape[0]

    out_dtype = x.dtype
    use_scratch = out_dtype != jnp.float32

    # Lane-dense padding: feature dims -> multiples of 128.
    Wp = _round_up(W, 128)
    Hp = _round_up(H, 128)

    tm, th, vmem_limit = _tile_config(
        M, Wp,
        x_bytes=x.dtype.itemsize,
        w_bytes=w_fc.dtype.itemsize,
        out_bytes=jnp.dtype(out_dtype).itemsize,
        use_scratch=use_scratch)

    Mp = _round_up(M, tm)
    if Hp <= th:
        th = Hp                            # whole hidden dim in one tile
    else:
        Hp = _round_up(Hp, th)             # pad hidden dim to a tile multiple

    need_pad_x = (Mp != M) or (Wp != W)
    x2p = jnp.pad(x2, ((0, Mp - M), (0, Wp - W))) if need_pad_x else x2
    wfc = (jnp.pad(w_fc, ((0, Wp - W), (0, Hp - H)))
           if (Wp != W or Hp != H) else w_fc)
    bfc = jnp.pad(b_fc, ((0, 0), (0, Hp - H))) if Hp != H else b_fc
    wpr = (jnp.pad(w_proj, ((0, Hp - H), (0, Wp - W)))
           if (Hp != H or Wp != W) else w_proj)
    bpr = jnp.pad(b_proj, ((0, 0), (0, Wp - W))) if Wp != W else b_proj

    grid = (Mp // tm, Hp // th)
    n_row_tiles = grid[0]

    # CostEstimate: weights (and their biases) are re-streamed once per row tile.
    weight_bytes = (wfc.size * wfc.dtype.itemsize
                    + bfc.size * bfc.dtype.itemsize
                    + wpr.size * wpr.dtype.itemsize
                    + bpr.size * bpr.dtype.itemsize)
    bytes_accessed = (x2p.size * x2p.dtype.itemsize
                      + n_row_tiles * weight_bytes
                      + Mp * Wp * jnp.dtype(out_dtype).itemsize)
    cost = pl.CostEstimate(
        flops=4 * Mp * Wp * Hp,            # two (Mp x Wp x Hp) matmuls
        transcendentals=Mp * Hp,           # erf/tanh per hidden activation
        bytes_accessed=bytes_accessed)

    if use_scratch:
        kernel = functools.partial(_mlp_kernel_scratch,
                                   approximate=approximate_gelu)
        scratch_shapes = [pltpu.VMEM((tm, Wp), jnp.float32)]
    else:
        kernel = functools.partial(_mlp_kernel_f32out,
                                   approximate=approximate_gelu)
        scratch_shapes = []

    out = pl.pallas_call(
        kernel,
        out_shape=jax.ShapeDtypeStruct((Mp, Wp), out_dtype),
        grid_spec=pltpu.PrefetchScalarGridSpec(
            num_scalar_prefetch=0,
            grid=grid,
            in_specs=[
                pl.BlockSpec((tm, Wp), lambda i, j: (i, 0)),   # x row tile
                pl.BlockSpec((Wp, th), lambda i, j: (0, j)),   # W_fc hidden slice
                pl.BlockSpec((1, th), lambda i, j: (0, j)),    # b_fc hidden slice
                pl.BlockSpec((th, Wp), lambda i, j: (j, 0)),   # W_proj hidden slice
                pl.BlockSpec((1, Wp), lambda i, j: (0, 0)),    # b_proj
            ],
            out_specs=pl.BlockSpec((tm, Wp), lambda i, j: (i, 0)),
            scratch_shapes=scratch_shapes,
        ),
        compiler_params=pltpu.CompilerParams(
            dimension_semantics=("parallel", "arbitrary"),
            vmem_limit_bytes=vmem_limit),
        cost_estimate=cost,
    )(x2p, wfc, bfc, wpr, bpr)

    out = out[:M, :W]
    return out.reshape(orig_shape)


def init_mlp_params(key, width, dtype=jnp.float32):
    """Deterministic init mirroring nn.Linear shapes (weights kept transposed
    so the kernel computes x @ W)."""
    k1, k2, k3, k4 = jax.random.split(key, 4)
    hidden = 4 * width
    bound_fc = 1.0 / math.sqrt(width)
    bound_proj = 1.0 / math.sqrt(hidden)
    w_fc = jax.random.uniform(k1, (width, hidden), dtype, -bound_fc, bound_fc)
    b_fc = jax.random.uniform(k2, (1, hidden), dtype, -bound_fc, bound_fc)
    w_proj = jax.random.uniform(k3, (hidden, width), dtype, -bound_proj, bound_proj)
    b_proj = jax.random.uniform(k4, (1, width), dtype, -bound_proj, bound_proj)
    return w_fc, b_fc, w_proj, b_proj


def mlp_ref(x, w_fc, b_fc, w_proj, b_proj):
    h = x @ w_fc + b_fc[0]
    h = 0.5 * h * (1.0 + jax.lax.erf(h * _INV_SQRT2))
    return h @ w_proj + b_proj[0]


if __name__ == "__main__":
    key = jax.random.PRNGKey(0)
    kx, kp = jax.random.split(key)

    batch, seq, width = 2, 8, 32
    x = jax.random.normal(kx, (batch, seq, width), jnp.float32)
    w_fc, b_fc, w_proj, b_proj = init_mlp_params(kp, width)

    # f32 path (direct output accumulation, no scratch).
    y = mlp_pallas(x, w_fc, b_fc, w_proj, b_proj)
    y = jax.block_until_ready(y)
    y_ref = mlp_ref(x.reshape(-1, width), w_fc, b_fc, w_proj, b_proj).reshape(x.shape)
    assert y.shape == x.shape
    assert jnp.allclose(y, y_ref, atol=1e-5, rtol=1e-5)

    # bf16 path (f32 scratch accumulator, cast on final hidden tile).
    x_bf = x.astype(jnp.bfloat16)
    params_bf = [p.astype(jnp.bfloat16) for p in (w_fc, b_fc, w_proj, b_proj)]
    y_bf = mlp_pallas(x_bf, *params_bf)
    y_bf = jax.block_until_ready(y_bf)
    y_bf_ref = mlp_ref(x_bf.astype(jnp.float32).reshape(-1, width),
                       *[p.astype(jnp.float32) for p in params_bf]).reshape(x.shape)
    assert y_bf.shape == x.shape
    assert jnp.allclose(y_bf.astype(jnp.float32), y_bf_ref, atol=1e-1, rtol=1e-1)

    print("KERNEL_OK")
</pallas_src>

<mosaic_0001>
module attributes {stable_mosaic.version = 11 : i64} {
  func.func @_mlp_kernel_f32out(%arg0: i32, %arg1: i32, %arg2: memref<16x128xf32, #tpu.memory_space<vmem>>, %arg3: memref<128x128xf32, #tpu.memory_space<vmem>>, %arg4: memref<1x128xf32, #tpu.memory_space<vmem>>, %arg5: memref<128x128xf32, #tpu.memory_space<vmem>>, %arg6: memref<1x128xf32, #tpu.memory_space<vmem>>, %arg7: memref<16x128xf32, #tpu.memory_space<vmem>>) attributes {dimension_semantics = [#tpu.dimension_semantics<parallel>, #tpu.dimension_semantics<arbitrary>], iteration_bounds = array<i64: 1, 1>, scalar_prefetch = 0 : i64, scratch_operands = 0 : i64, tpu.core_type = #tpu.core_type<tc>, window_params = [{transform_indices = @transform_0, window_bounds = array<i64: 16, 128>}, {transform_indices = @transform_1, window_bounds = array<i64: 128, 128>}, {transform_indices = @transform_2, window_bounds = array<i64: 1, 128>}, {transform_indices = @transform_3, window_bounds = array<i64: 128, 128>}, {pipeline_mode = #tpu.pipeline_mode<synchronous>, transform_indices = @transform_4, window_bounds = array<i64: 1, 128>}, {transform_indices = @transform_5, window_bounds = array<i64: 16, 128>}]} {
    %c0 = arith.constant 0 : index
    %c0_0 = arith.constant 0 : index
    %0 = vector.load %arg2[%c0, %c0_0] : memref<16x128xf32, #tpu.memory_space<vmem>>, vector<16x128xf32>
    %c0_1 = arith.constant 0 : index
    %c0_2 = arith.constant 0 : index
    %1 = vector.load %arg3[%c0_1, %c0_2] : memref<128x128xf32, #tpu.memory_space<vmem>>, vector<128x128xf32>
    %cst = arith.constant dense<0.000000e+00> : vector<16x128xf32>
    %2 = tpu.matmul %0, %1, %cst {dimension_numbers = #tpu.dot_dimension_numbers<[1], [0], [0], [1], [0, 0, 1, 1], [], []>} : vector<16x128xf32>, vector<128x128xf32>, vector<16x128xf32> -> vector<16x128xf32>
    %c0_3 = arith.constant 0 : index
    %c0_4 = arith.constant 0 : index
    %3 = vector.load %arg4[%c0_3, %c0_4] : memref<1x128xf32, #tpu.memory_space<vmem>>, vector<1x128xf32>
    %4 = vector.broadcast %3 : vector<1x128xf32> to vector<16x128xf32>
    %5 = arith.addf %2, %4 : vector<16x128xf32>
    %cst_5 = arith.constant 5.000000e-01 : f32
    %6 = vector.broadcast %cst_5 : f32 to vector<16x128xf32>
    %7 = arith.mulf %6, %5 : vector<16x128xf32>
    %cst_6 = arith.constant 0.707106769 : f32
    %8 = vector.broadcast %cst_6 : f32 to vector<16x128xf32>
    %9 = arith.mulf %5, %8 : vector<16x128xf32>
    %10 = math.erf %9 : vector<16x128xf32>
    %cst_7 = arith.constant 1.000000e+00 : f32
    %11 = vector.broadcast %cst_7 : f32 to vector<16x128xf32>
    %12 = arith.addf %11, %10 : vector<16x128xf32>
    %13 = arith.mulf %7, %12 : vector<16x128xf32>
    %c0_8 = arith.constant 0 : index
    %c0_9 = arith.constant 0 : index
    %14 = vector.load %arg5[%c0_8, %c0_9] : memref<128x128xf32, #tpu.memory_space<vmem>>, vector<128x128xf32>
    %cst_10 = arith.constant dense<0.000000e+00> : vector<16x128xf32>
    %15 = tpu.matmul %13, %14, %cst_10 {dimension_numbers = #tpu.dot_dimension_numbers<[1], [0], [0], [1], [0, 0, 1, 1], [], []>} : vector<16x128xf32>, vector<128x128xf32>, vector<16x128xf32> -> vector<16x128xf32>
    %c0_i32 = arith.constant 0 : i32
    %16 = arith.cmpi eq, %arg1, %c0_i32 : i32
    %17 = arith.extui %16 : i1 to i32
    %c0_i32_11 = arith.constant 0 : i32
    %18 = arith.cmpi ne, %17, %c0_i32_11 : i32
    scf.if %18 {
      %c0_14 = arith.constant 0 : index
      %c0_15 = arith.constant 0 : index
      %22 = vector.load %arg6[%c0_14, %c0_15] : memref<1x128xf32, #tpu.memory_space<vmem>>, vector<1x128xf32>
      %23 = vector.broadcast %22 : vector<1x128xf32> to vector<16x128xf32>
      %24 = arith.addf %15, %23 : vector<16x128xf32>
      %c0_16 = arith.constant 0 : index
      %c0_17 = arith.constant 0 : index
      %25 = vector.load %arg7[%c0_16, %c0_17] : memref<16x128xf32, #tpu.memory_space<vmem>>, vector<16x128xf32>
      tpu.vector_store %arg7[%c0_16, %c0_17], %24 {strides = array<i32>} : memref<16x128xf32, #tpu.memory_space<vmem>>, vector<16x128xf32>,
    } else {
    }
    %c0_i32_12 = arith.constant 0 : i32
    %19 = arith.cmpi sgt, %arg1, %c0_i32_12 : i32
    %20 = arith.extui %19 : i1 to i32
    %c0_i32_13 = arith.constant 0 : i32
    %21 = arith.cmpi ne, %20, %c0_i32_13 : i32
    scf.if %21 {
      %c0_14 = arith.constant 0 : index
      %c0_15 = arith.constant 0 : index
      %22 = vector.load %arg7[%c0_14, %c0_15] : memref<16x128xf32, #tpu.memory_space<vmem>>, vector<16x128xf32>
      %23 = arith.addf %22, %15 : vector<16x128xf32>
      %c0_16 = arith.constant 0 : index
      %c0_17 = arith.constant 0 : index
      %24 = vector.load %arg7[%c0_16, %c0_17] : memref<16x128xf32, #tpu.memory_space<vmem>>, vector<16x128xf32>
      tpu.vector_store %arg7[%c0_16, %c0_17], %23 {strides = array<i32>} : memref<16x128xf32, #tpu.memory_space<vmem>>, vector<16x128xf32>,
    } else {
    }
    return
  }
  func.func @transform_0(%arg0: i32, %arg1: i32) -> (i32, i32) {
    %c0_i32 = arith.constant 0 : i32
    %c0_i32_0 = arith.constant 0 : i32
    return %arg0, %c0_i32 : i32, i32
  }
  func.func @transform_1(%arg0: i32, %arg1: i32) -> (i32, i32) {
    %c0_i32 = arith.constant 0 : i32
    %c0_i32_0 = arith.constant 0 : i32
    return %c0_i32, %arg1 : i32, i32
  }
  func.func @transform_2(%arg0: i32, %arg1: i32) -> (i32, i32) {
    %c0_i32 = arith.constant 0 : i32
    %c0_i32_0 = arith.constant 0 : i32
    return %c0_i32, %arg1 : i32, i32
  }
  func.func @transform_3(%arg0: i32, %arg1: i32) -> (i32, i32) {
    %c0_i32 = arith.constant 0 : i32
    %c0_i32_0 = arith.constant 0 : i32
    return %arg1, %c0_i32 : i32, i32
  }
  func.func @transform_4(%arg0: i32, %arg1: i32) -> (i32, i32) {
    %c0_i32 = arith.constant 0 : i32
    %c0_i32_0 = arith.constant 0 : i32
    %c0_i32_1 = arith.constant 0 : i32
    return %c0_i32, %c0_i32_0 : i32, i32
  }
  func.func @transform_5(%arg0: i32, %arg1: i32) -> (i32, i32) {
    %c0_i32 = arith.constant 0 : i32
    %c0_i32_0 = arith.constant 0 : i32
    return %arg0, %c0_i32 : i32, i32
  }
}

</mosaic_0001>

<bundles_post_ra>
// kernel: tpu_custom_call.1
= control target key start
LH: loop header
LB: loop body
LE: loop exit
PB: predicated region body
PF: predicated region fallthrough
CT: control target
= control target key end

     0   :  { %10 = vsyncpa [#allocation3], 0  ;;  %s526_s0 = inlined_call_operand.hbm [shape: f32[16,128], index: 0, kind: input, shape index: {}]   ;;  %s527_s1 = inlined_call_operand.hbm [shape: f32[128,128], index: 1, kind: input, shape index: {}]   ;;  %s528_s2 = inlined_call_operand.vmem [shape: f32[1,128], index: 2, kind: input, shape index: {}]   ;;  %s529_s3 = inlined_call_operand.hbm [shape: f32[128,128], index: 3, kind: input, shape index: {}]   ;;  %s530_s4 = inlined_call_operand.vmem [shape: f32[1,128], index: 4, kind: input, shape index: {}]   ;;  %s531_s5 = inlined_call_operand.hbm [shape: f32[16,128], index: 5, kind: output, shape index: {}]  }
   0x1   :  { %11 = vsyncpa [#allocation6], 0 }
   0x2   :  { %12 = vsyncpa [#allocation4], 0  ;;  %s30_s20 = sshll.u32 %s527_s1, 4  ;;  %s430_s21 = smov [#allocation5]   ;;  %s31_s20 = int_to_ptr.hbm [resolvable:$true] %s30_s20 }
   0x3   :  { %s32_s22 = sshll.u32 %s430_s21, 4  ;;  %s17_s25 = sshll.u32 %s526_s0, 4  ;;  %s33_s22 = int_to_ptr.vmem [resolvable:$true] %s32_s22  ;;  %s18_s25 = int_to_ptr.hbm [resolvable:$true] %s17_s25 }
   0x4   :  { %s431_s26 = smov 128   ;;  %s432_s27 = smov 8  }
   0x5   :  { %38 = dma.hbm_to_vmem [thread:$0]  %s31_s20, 2048, %s33_s22, [#allocation6], %s431_s26, %s431_s26, %s432_s27  }
   0x6   :  { %s433_s28 = smov [#allocation2]   ;;  %s45_s1 = sshll.u32 %s529_s3, 4  ;;  %s46_s1 = int_to_ptr.hbm [resolvable:$true] %s45_s1 }
   0x7   :  { %s19_s29 = sshll.u32 %s433_s28, 4  ;;  %s434_s0 = smov [#allocation7]   ;;  %s20_s29 = int_to_ptr.vmem [resolvable:$true] %s19_s29 }
   0x8   :  { %25 = dma.hbm_to_vmem [thread:$0]  %s18_s25, 256, %s20_s29, [#allocation3], %s431_s26, %s431_s26, %s432_s27  }
   0x9   :  { %s47_s7 = sshll.u32 %s434_s0, 4  ;;  %s48_s7 = int_to_ptr.vmem [resolvable:$true] %s47_s7 }
   0xa   :  { %53 = dma.hbm_to_vmem [thread:$0]  %s46_s1, 2048, %s48_s7, [#allocation6], %s431_s26, %s431_s26, %s432_s27  }
   0xb   :  { %424 = dma.done.wait [#allocation3], 256  }
   0xc   :  { %425 = vsyncadd [#allocation3], 4294967040 }
   0xd   :  { %426 = dma.done.wait [#allocation6], 4096  }
   0xe   :  { %427 = vsyncadd [#allocation6], 4294963200  ;;  %v85_v0 = vld [vmem:[#allocation5 + $0x78] sm:$0xff]  ;;  %v84_v1 = vld [vmem:[#allocation5 + $0x70] sm:$0xff]  ;;  %s435_s10 = smov [#allocation8]   ;;  %s268_s14 = sshll.u32 %s531_s5, 4  ;;  %s269_s14 = int_to_ptr.hbm [resolvable:$true] %s268_s14 }
   0xf   :  { %90 = vmatpush.msra.mxu0 %v85_v0  ;;  %284 = vmatpush.msra.mxu2 %v85_v0  ;;  %v83_v2 = vld [vmem:[#allocation5 + $0x68] sm:$0xff]  ;;  %v82_v3 = vld [vmem:[#allocation5 + $0x60] sm:$0xff]  ;;  %v81_v4 = vld [vmem:[#allocation5 + $0x58] sm:$0xff]  ;;  %s266_s11 = sshll.u32 %s435_s10, 4  ;;  %s267_s11 = int_to_ptr.vmem [resolvable:$true] %s266_s11 }
  0x10   :  { %v80_v5 = vld [vmem:[#allocation5 + $0x50] sm:$0xff]  ;;  %v79_v6 = vld [vmem:[#allocation5 + $0x48] sm:$0xff]  ;;  %v78_v7 = vld [vmem:[#allocation5 + $0x40] sm:$0xff] }
  0x11   :  { %91 = vmatpush.msra.mxu0 %v84_v1  ;;  %285 = vmatpush.msra.mxu2 %v84_v1  ;;  %v77_v8 = vld [vmem:[#allocation5 + $0x38] sm:$0xff]  ;;  %v76_v9 = vld [vmem:[#allocation5 + $0x30] sm:$0xff]  ;;  %v75_v10 = vld [vmem:[#allocation5 + $0x28] sm:$0xff] }
  0x12   :  { %v74_v11 = vld [vmem:[#allocation5 + $0x20] sm:$0xff]  ;;  %v73_v12 = vld [vmem:[#allocation5 + $0x18] sm:$0xff]  ;;  %v72_v13 = vld [vmem:[#allocation5 + $0x10] sm:$0xff] }
  0x13   :  { %92 = vmatpush.msra.mxu0 %v83_v2  ;;  %286 = vmatpush.msra.mxu2 %v83_v2  ;;  %v71_v14 = vld [vmem:[#allocation5 + $0x8] sm:$0xff]  ;;  %v70_v15 = vld [vmem:[#allocation5] sm:$0xff]  ;;  %v68_v16 = vld [vmem:[#allocation2] sm:$0xff] }
  0x14   :  { %v69_v17 = vld [vmem:[#allocation2 + $0x8] sm:$0xff]  ;;  %v215_v19 = vld [vmem:[#allocation7 + $0x70] sm:$0xff]  ;;  %v214_v20 = vld [vmem:[#allocation7 + $0x68] sm:$0xff] }
  0x15   :  { %93 = vmatpush.msra.mxu0 %v82_v3  ;;  %287 = vmatpush.msra.mxu2 %v82_v3  ;;  %v216_v18 = vld [vmem:[#allocation7 + $0x78] sm:$0xff]  ;;  %v213_v21 = vld [vmem:[#allocation7 + $0x60] sm:$0xff]  ;;  %v322_v22 = vld [vmem:[%s528_s2] ss:$0 sm:$0xff] }
  0x16   :  { %217 = vmatpush.msra.mxu1 %v216_v18  ;;  %300 = vmatpush.msra.mxu3 %v216_v18  ;;  %v212_v23 = vld [vmem:[#allocation7 + $0x58] sm:$0xff]  ;;  %v211_v25 = vld [vmem:[#allocation7 + $0x50] sm:$0xff]  ;;  %v210_v27 = vld [vmem:[#allocation7 + $0x48] sm:$0xff] }
  0x17   :  { %94 = vmatpush.msra.mxu0 %v81_v4  ;;  %288 = vmatpush.msra.mxu2 %v81_v4  ;;  %v209_v29 = vld [vmem:[#allocation7 + $0x40] sm:$0xff]  ;;  %v208_v30 = vld [vmem:[#allocation7 + $0x38] sm:$0xff]  ;;  %v207_v33 = vld [vmem:[#allocation7 + $0x30] sm:$0xff] }
  0x18   :  { %218 = vmatpush.msra.mxu1 %v215_v19  ;;  %301 = vmatpush.msra.mxu3 %v215_v19  ;;  %v206_v36 = vld [vmem:[#allocation7 + $0x28] sm:$0xff]  ;;  %v205_v39 = vld [vmem:[#allocation7 + $0x20] sm:$0xff]  ;;  %v204_v43 = vld [vmem:[#allocation7 + $0x18] sm:$0xff] }
  0x19   :  { %95 = vmatpush.msra.mxu0 %v80_v5  ;;  %289 = vmatpush.msra.mxu2 %v80_v5  ;;  %v203_v47 = vld [vmem:[#allocation7 + $0x10] sm:$0xff]  ;;  %v202_v52 = vld [vmem:[#allocation7 + $0x8] sm:$0xff]  ;;  %v201_v56 = vld [vmem:[#allocation7] sm:$0xff] }
  0x1a   :  { %219 = vmatpush.msra.mxu1 %v214_v20  ;;  %302 = vmatpush.msra.mxu3 %v214_v20 }
  0x1b   :  { %96 = vmatpush.msra.mxu0 %v79_v6  ;;  %290 = vmatpush.msra.mxu2 %v79_v6 }
  0x1c   :  { %220 = vmatpush.msra.mxu1 %v213_v21  ;;  %303 = vmatpush.msra.mxu3 %v213_v21 }
  0x1d   :  { %97 = vmatpush.msra.mxu0 %v78_v7  ;;  %291 = vmatpush.msra.mxu2 %v78_v7 }
  0x1e   :  { %221 = vmatpush.msra.mxu1 %v212_v23  ;;  %304 = vmatpush.msra.mxu3 %v212_v23 }
  0x1f   :  { %98 = vmatpush.msra.mxu0 %v77_v8  ;;  %292 = vmatpush.msra.mxu2 %v77_v8 }
  0x20   :  { %222 = vmatpush.msra.mxu1 %v211_v25  ;;  %305 = vmatpush.msra.mxu3 %v211_v25 }
  0x21   :  { %99 = vmatpush.msra.mxu0 %v76_v9  ;;  %293 = vmatpush.msra.mxu2 %v76_v9 }
  0x22   :  { %223 = vmatpush.msra.mxu1 %v210_v27  ;;  %306 = vmatpush.msra.mxu3 %v210_v27 }
  0x23   :  { %100 = vmatpush.msra.mxu0 %v75_v10  ;;  %294 = vmatpush.msra.mxu2 %v75_v10 }
  0x24   :  { %224 = vmatpush.msra.mxu1 %v209_v29  ;;  %307 = vmatpush.msra.mxu3 %v209_v29 }
  0x25   :  { %101 = vmatpush.msra.mxu0 %v74_v11  ;;  %295 = vmatpush.msra.mxu2 %v74_v11 }
  0x26   :  { %225 = vmatpush.msra.mxu1 %v208_v30  ;;  %308 = vmatpush.msra.mxu3 %v208_v30 }
  0x27   :  { %102 = vmatpush.msra.mxu0 %v73_v12  ;;  %296 = vmatpush.msra.mxu2 %v73_v12 }
  0x28   :  { %226 = vmatpush.msra.mxu1 %v207_v33  ;;  %309 = vmatpush.msra.mxu3 %v207_v33 }
  0x29   :  { %103 = vmatpush.msra.mxu0 %v72_v13  ;;  %297 = vmatpush.msra.mxu2 %v72_v13 }
  0x2a   :  { %227 = vmatpush.msra.mxu1 %v206_v36  ;;  %310 = vmatpush.msra.mxu3 %v206_v36 }
  0x2b   :  { %104 = vmatpush.msra.mxu0 %v71_v14  ;;  %298 = vmatpush.msra.mxu2 %v71_v14 }
  0x2c   :  { %228 = vmatpush.msra.mxu1 %v205_v39  ;;  %311 = vmatpush.msra.mxu3 %v205_v39 }
  0x2d   :  { %105 = vmatpush.msra.mxu0 %v70_v15  ;;  %299 = vmatpush.msra.mxu2 %v70_v15 }
  0x2e   :  { %106 = vmatmul.f32.vlgmr.msra.gmra.mxu0 %v68_v16  ;;  %109 = vmatmul.f32.vlgmr.msra.gmra.mxu2 %v69_v17 }
  0x2f   :  { %229 = vmatpush.msra.mxu1 %v204_v43  ;;  %312 = vmatpush.msra.mxu3 %v204_v43 }
  0x31   :  { %230 = vmatpush.msra.mxu1 %v203_v47  ;;  %313 = vmatpush.msra.mxu3 %v203_v47 }
  0x33   :  { %231 = vmatpush.msra.mxu1 %v202_v52  ;;  %314 = vmatpush.msra.mxu3 %v202_v52 }
  0x35   :  { %232 = vmatpush.msra.mxu1 %v201_v56  ;;  %315 = vmatpush.msra.mxu3 %v201_v56  ;;  %v323_v56 = vld [vmem:[%s530_s4] ss:$0 sm:$0xff] }
  0xab   :  { %v107_v24 = vpop.f32.mrf.mxu0 }
  0xac   :  { %v487_v26 = vadd.f32 %v322_v22, %v107_v24 }
  0xae   :  { %v490_v28 = vmul.f32 0.70710677, %v487_v26  ;;  %v113_v47 = vmul.f32 0.5, %v487_v26 }
  0xb0   :  { %v117_v31 = vmul.f32 %v490_v28, %v490_v28 }
  0xb1   :  { %v110_v32 = vpop.f32.mrf.mxu2 }
  0xb2   :  { %v494_v34 = vmin.f32 %v117_v31, 16.0  ;;  %v496_v35 = vadd.f32 %v322_v22, %v110_v32 }
  0xb4   :  { %v119_v37 = vmul.f32 2.1237322e-06, %v494_v34  ;;  %v500_v38 = vmul.f32 0.70710677, %v496_v35  ;;  %v130_v40 = vmul.f32 3.8918573e-05, %v494_v34 }
  0xb6   :  { %v120_v41 = vadd.f32 0.00028619796, %v119_v37  ;;  %v157_v42 = vmul.f32 %v500_v38, %v500_v38  ;;  %v131_v44 = vadd.f32 0.001143296, %v130_v40 }
  0xb8   :  { %v121_v45 = vmul.f32 %v120_v41, %v494_v34  ;;  %v158_v46 = vmin.f32 %v157_v42, 16.0  ;;  %v132_v48 = vmul.f32 %v131_v44, %v494_v34 }
  0xba   :  { %v159_v49 = vmul.f32 2.1237322e-06, %v158_v46  ;;  %v170_v50 = vmul.f32 3.8918573e-05, %v158_v46  ;;  %v122_v51 = vadd.f32 0.0036580483, %v121_v45 }
  0xbb   :  { %v133_v53 = vadd.f32 0.014752088, %v132_v48 }
  0xbc   :  { %v160_v54 = vadd.f32 0.00028619796, %v159_v49  ;;  %v171_v55 = vadd.f32 0.001143296, %v170_v50  ;;  %v123_v60 = vmul.f32 %v122_v51, %v494_v34 }
  0xbd   :  { %v134_v57 = vmul.f32 %v133_v53, %v494_v34  ;;  %v114_v53 = vmul.f32 0.5, %v496_v35 }
  0xbe   :  { %v161_v58 = vmul.f32 %v160_v54, %v158_v46  ;;  %v172_v59 = vmul.f32 %v171_v55, %v158_v46  ;;  %v124_v2 = vadd.f32 0.05243302, %v123_v60 }
  0xbf   :  { %v135_v61 = vadd.f32 0.112945676, %v134_v57 }
  0xc0   :  { %v162_v62 = vadd.f32 0.0036580483, %v161_v58  ;;  %v173_v63 = vadd.f32 0.014752088, %v172_v59  ;;  %v125_v8 = vmul.f32 %v124_v2, %v494_v34 }
  0xc1   :  { %v136_v0 = vmul.f32 %v135_v61, %v494_v34 }
  0xc2   :  { %v174_v1 = vmul.f32 %v173_v63, %v158_v46  ;;  %v163_v4 = vmul.f32 %v162_v62, %v158_v46  ;;  %v126_v13 = vadd.f32 0.18741608, %v125_v8 }
  0xc3   :  { %v137_v3 = vadd.f32 0.4994258, %v136_v0 }
  0xc4   :  { %v175_v5 = vadd.f32 0.112945676, %v174_v1  ;;  %v164_v10 = vadd.f32 0.05243302, %v163_v4  ;;  %v127_v17 = vmul.f32 %v126_v13, %v494_v34 }
  0xc5   :  { %v138_v6 = vmul.f32 %v137_v3, %v494_v34 }
  0xc6   :  { %v176_v7 = vmul.f32 %v175_v5, %v158_v46  ;;  %v165_v14 = vmul.f32 %v164_v10, %v158_v46  ;;  %v128_v21 = vadd.f32 1.1283791, %v127_v17 }
  0xc7   :  { %v139_v9 = vadd.f32 1.0, %v138_v6 }
  0xc8   :  { %v177_v11 = vadd.f32 0.4994258, %v176_v7  ;;  %v166_v18 = vadd.f32 0.18741608, %v165_v14  ;;  %v129_v31 = vmul.f32 %v128_v21, %v490_v28 }
  0xc9   :  { %324 = vrcp.f32 %v139_v9  ;;  %v151_v22 = vand.u32 2147483648, %v139_v9  ;;  %v149_v27 = vand.u32 2147483647, %v139_v9  ;;  %vm145_vm1 = vweird.f32 %v139_v9 }
  0xca   :  { %v178_v12 = vmul.f32 %v177_v11, %v158_v46  ;;  %v167_v24 = vmul.f32 %v166_v18, %v158_v46 }
  0xcb   :  { %v152_v32 = vor.u32 1.1754944e-38, %v151_v22  ;;  %vm150_vm3 = vcmp.eq.f32.partialorder %v149_v27, 8.507059e+37 }
  0xcc   :  { %v179_v15 = vadd.f32 1.0, %v178_v12  ;;  %v168_v36 = vadd.f32 1.1283791, %v167_v24 }
  0xce   :  { %326 = vrcp.f32 %v179_v15  ;;  %v191_v37 = vand.u32 2147483648, %v179_v15  ;;  %v189_v41 = vand.u32 2147483647, %v179_v15  ;;  %vm185_vm5 = vweird.f32 %v179_v15 }
  0xcf   :  { %v325_v16 = vpop.eup %324  ;;  %v169_v46 = vmul.f32 %v168_v36, %v500_v38 }
  0xd0   :  { %v141_v19 = vmul.f32 %v325_v16, %v139_v9  ;;  %vm146_vm0 = vweird.f32 %v325_v16  ;;  %v192_v45 = vor.u32 1.1754944e-38, %v191_v37  ;;  %vm190_vm7 = vcmp.eq.f32.partialorder %v189_v41, 8.507059e+37 }
  0xd1   :  { %vm147_vm2 = vmor %vm145_vm1, %vm146_vm0 }
  0xd2   :  { %v142_v20 = vsub.f32 1.0, %v141_v19 }
  0xd4   :  { %v327_v23 = vpop.eup %326  ;;  %v143_v25 = vmul.f32 %v325_v16, %v142_v20 }
  0xd5   :  { %v181_v29 = vmul.f32 %v327_v23, %v179_v15  ;;  %vm186_vm4 = vweird.f32 %v327_v23 }
  0xd6   :  { %v144_v30 = vadd.f32 %v325_v16, %v143_v25  ;;  %vm187_vm6 = vmor %vm185_vm5, %vm186_vm4 }
  0xd7   :  { %v182_v33 = vsub.f32 1.0, %v181_v29 }
  0xd8   :  { %v148_v34 = vsel %vm147_vm2, %v325_v16, %v144_v30 }
  0xd9   :  { %v153_v39 = vsel %vm150_vm3, %v152_v32, %v148_v34  ;;  %v183_v40 = vmul.f32 %v327_v23, %v182_v33 }
  0xda   :  { %v154_v42 = vmul.f32 %v153_v39, %v129_v31 }
  0xdb   :  { %v184_v43 = vadd.f32 %v327_v23, %v183_v40 }
  0xdc   :  { %v282_v44 = vclamps-f32 %v154_v42, 1.0 }
  0xdd   :  { %v188_v28 = vsel %vm187_vm6, %v327_v23, %v184_v43 }
  0xde   :  { %v197_v48 = vadd.f32 1.0, %v282_v44  ;;  %v193_v49 = vsel %vm190_vm7, %v192_v45, %v188_v28 }
  0xdf   :  { %v194_v50 = vmul.f32 %v193_v49, %v169_v46 }
  0xe0   :  { %v199_v51 = vmul.f32 %v197_v48, %v113_v47 }
  0xe1   :  { %v283_v52 = vclamps-f32 %v194_v50, 1.0 }
  0xe2   :  { %233 = vmatmul.f32.vlgmr.msra.gmra.mxu1 %v199_v51 }
  0xe3   :  { %v198_v54 = vadd.f32 1.0, %v283_v52 }
  0xe5   :  { %v200_v55 = vmul.f32 %v198_v54, %v114_v53 }
  0xe7   :  { %236 = vmatmul.f32.vlgmr.msra.gmra.mxu3 %v200_v55 }
 0x15f   :  { %v234_v38 = vpop.f32.mrf.mxu1 }
 0x160   :  { %v248_v57 = vadd.f32 %v323_v56, %v234_v38 }
 0x162   :  { %250 = vst [vmem:[#allocation8] sm:$0xff] %v248_v57 }
 0x16a   :  { %v237_v26 = vpop.f32.mrf.mxu3 }
 0x16b   :  { %v249_v58 = vadd.f32 %v323_v56, %v237_v26 }
 0x16d   :  { %251 = vst [vmem:[#allocation8 + $0x8] sm:$0xff] %v249_v58 }
 0x16e   :  { %274 = dma.vmem_to_hbm [thread:$0]  %s267_s11, 256, %s269_s14, [#allocation4], %s431_s26, %s431_s26, %s432_s27  }
 0x16f   :  { %428 = dma.done.wait [#allocation4], 256  }
 0x170   :  { %429 = vsyncadd [#allocation4], 4294967040 }
 0x171   :  { %279 = vsyncpa [#allocation3], 1 }
 0x172   :  { %280 = vsyncpa [#allocation6], 1 }
 0x173   :  { %281 = vsyncpa [#allocation4], 1 }

</bundles_post_ra>
